<compile_context>
chip_gen: v7x
topology: tpu7x:2x2x1
jax: 0.10.0
libtpu: 0.0.40
codegen_flags: <defaults>
</compile_context>

<pallas_src>
import functools
import math

import jax
import jax.numpy as jnp
import numpy as np
from jax import lax
from jax.experimental import pallas as pl
from jax.experimental.pallas import tpu as pltpu


def _round_up(x, m):
    return (x + m - 1) // m * m


def _hyp_supcon_kernel(fa_ref, fb_ref, la_ref, lb_ref, na2_ref, nb2_ref,
                       ina_ref, inbs_ref, out_ref,
                       m_ref, l_ref, spos_ref, npos_ref, *,
                       c, alpha_d, temperature, base_temperature, n_valid, n_pad):
    """One (TM anchor rows) x (TN contrast cols) block, flash-style running softmax."""
    tm = fa_ref.shape[0]
    tn = fb_ref.shape[0]
    i = pl.program_id(0)
    j = pl.program_id(1)
    nj = pl.num_programs(1)

    # ---- per-anchor-row running state: (re)initialize on the first column step ----
    @pl.when(j == 0)
    def _():
        m_ref[...] = jnp.full_like(m_ref, -jnp.inf)
        l_ref[...] = jnp.zeros_like(l_ref)
        spos_ref[...] = jnp.zeros_like(spos_ref)
        npos_ref[...] = jnp.zeros_like(npos_ref)

    # ---- Gram block on the MXU (f32; kernel is EUP/VPU-bound, not MXU-bound) ------
    gram = lax.dot_general(fa_ref[...], fb_ref[...], (((1,), (1,)), ((), ())),
                           preferred_element_type=jnp.float32,
                           precision=lax.Precision.HIGHEST)           # (TM, TN)

    na2 = na2_ref[...]                     # (TM, 1)  ||a_i||^2  (hoisted to wrapper)
    nb2 = nb2_ref[...]                     # (1, TN)  ||b_j||^2  (hoisted to wrapper)

    two_c = 2.0 * c
    sqrt_c = c ** 0.5

    beta = 1.0 - c * na2                   # (TM,1) column scalars — cheap per step
    w1 = c * na2
    w2 = two_c * beta
    w3 = c * beta * beta

    tg = two_c * gram                      # (TM,TN)
    alpha_p = (1.0 + c * nb2) - tg         # (TM,TN)
    denom = (1.0 + (c * c) * na2 * nb2) - tg

    # c * ||mobius_add(-a, b, c)_num||^2, factored to drop one (TM,TN) multiply.
    s = alpha_p * (w1 * alpha_p - w2 * gram) + w3 * nb2
    s = jnp.maximum(s, 0.0)

    d = jnp.abs(denom)
    r = jnp.sqrt(s)                                    # EUP
    r = jnp.minimum(r, (1.0 - 1e-5) * d)               # clamp(z = r/d, max = 1-1e-5)
    # dist part: -2/sqrt(c) * atanh(z) = -1/sqrt(c) * log((d+r)/(d-r)).
    # Single fused divide (one EUP reciprocal; Newton step on the VALU) replaces the
    # previous pair {recip(|denom|), recip(1-z)} and avoids the near-boundary recip.
    log_ratio = jnp.log((d + r) / (d - r))             # EUP log (+ one EUP recip)

    coef_log = -alpha_d / (temperature * sqrt_c)
    # ang_sim is a rank-1 rescale of gram; row factor already carries (1-alpha_d)/T.
    sim = coef_log * log_ratio + (gram * ina_ref[...]) * inbs_ref[...]

    # ---- masks built in-kernel (no N^2 DMA) ---------------------------------------
    col_ids = j * tn + lax.broadcasted_iota(jnp.int32, (tm, tn), 1)
    row_ids = i * tm + lax.broadcasted_iota(jnp.int32, (tm, tn), 0)
    keep = col_ids != row_ids                          # ~eye(N)
    if n_valid < n_pad:                                # static (trace-time)
        keep = jnp.logical_and(keep, col_ids < n_valid)
    pos_f = jnp.logical_and(la_ref[...] == lb_ref[...], keep).astype(jnp.float32)

    # ---- online softmax update (row max over UNMASKED sim, matching torch) --------
    m_prev = m_ref[...]
    m_new = jnp.maximum(m_prev, jnp.max(sim, axis=1, keepdims=True))
    corr = jnp.exp(m_prev - m_new)
    p = jnp.exp(jnp.where(keep, sim, -jnp.inf) - m_new)          # masked -> exp = 0
    l_ref[...] = l_ref[...] * corr + jnp.sum(p, axis=1, keepdims=True)
    m_ref[...] = m_new
    spos_ref[...] += jnp.sum(pos_f * sim, axis=1, keepdims=True)
    npos_ref[...] += jnp.sum(pos_f, axis=1, keepdims=True)

    # ---- finalize: sum(pos*log_prob) = spos - npos*(m + log(l + 1e-10)) ------------
    @pl.when(j == nj - 1)
    def _():
        npos = npos_ref[...]
        nposc = jnp.where(npos < 1e-6, 1.0, npos)
        lse = m_ref[...] + jnp.log(l_ref[...] + 1e-10)
        mlpp = (spos_ref[...] - npos * lse) / nposc
        out_ref[...] = (-(temperature / base_temperature)) * mlpp


def _vmem_limit_bytes():
    """Generation-aware scoped-VMEM limit (~75% of per-core capacity)."""
    try:
        cap = int(pltpu.get_tpu_info().vmem_capacity_bytes)
        return max(32 * 1024 * 1024, int(cap * 0.75))
    except Exception:
        return 48 * 1024 * 1024        # conservative fallback (fits v7x's 64 MiB/TC)


def hyperbolic_supcon_loss(features, labels, c=0.01, alpha_d=0.5,
                           temperature=0.07, base_temperature=0.07,
                           block_rows=None, block_cols=512):
    """features: [bsz, n_views, dim]; labels: [bsz] int. Returns scalar loss."""
    bsz, n_views, dim = features.shape
    N = bsz * n_views
    f = features.reshape(N, dim).astype(jnp.float32)    # matches torch .view ordering

    vmem_limit = _vmem_limit_bytes()
    if block_rows is None:
        # 256-row strips on 128-MiB-VMEM parts (v5e/v6e); 128 on v7x (64 MiB/TC).
        block_rows = 256 if vmem_limit >= 80 * 1024 * 1024 else 128

    # ---- tiling: TM multiple of 8; TN multiple of 128 (or the full padded extent) --
    n8 = _round_up(N, 8)
    tm = min(_round_up(max(int(block_rows), 8), 8), n8)
    n_pad = _round_up(N, tm)
    tn_req = max(int(block_cols), 128)
    if n_pad <= tn_req:
        tn = n_pad                                      # single column step (resident)
    else:
        tn = _round_up(tn_req, 128)
        step = tm * tn // math.gcd(tm, tn)
        n_pad = _round_up(N, step)
    d_pad = _round_up(dim, 128)

    f_p = jnp.zeros((n_pad, d_pad), jnp.float32).at[:N, :dim].set(f)

    # torch:  mask = eq(labels, labels.T).repeat(cc, cc)  =>  row i <-> labels[i % bsz]
    row_labels = jnp.tile(labels.reshape(-1).astype(jnp.int32), n_views)      # (N,)
    lab_p = jnp.full((n_pad,), -1, jnp.int32).at[:N].set(row_labels)  # pad label never matches
    lab_col = lab_p.reshape(n_pad, 1)
    lab_row = lab_p.reshape(1, n_pad)

    # Hoisted per-row scalars: squared norms + (scaled) inverse norms (F.normalize eps).
    sq = jnp.sum(f_p * f_p, axis=1)
    norm = jnp.maximum(jnp.sqrt(sq), 1e-12)
    na2_col = sq.reshape(n_pad, 1)
    nb2_row = sq.reshape(1, n_pad)
    inv_na_col = (1.0 / norm).reshape(n_pad, 1)
    inv_nbs_row = (((1.0 - alpha_d) / temperature) / norm).reshape(1, n_pad)

    kernel = functools.partial(
        _hyp_supcon_kernel,
        c=float(c), alpha_d=float(alpha_d),
        temperature=float(temperature), base_temperature=float(base_temperature),
        n_valid=N, n_pad=n_pad,
    )

    grid = (n_pad // tm, n_pad // tn)
    loss_rows = pl.pallas_call(
        kernel,
        out_shape=jax.ShapeDtypeStruct((n_pad, 1), jnp.float32),
        grid=grid,
        in_specs=[
            pl.BlockSpec((tm, d_pad), lambda i, j: (i, 0)),   # anchor rows (own spec)
            pl.BlockSpec((tn, d_pad), lambda i, j: (j, 0)),   # contrast rows (streamed)
            pl.BlockSpec((tm, 1), lambda i, j: (i, 0)),       # anchor labels
            pl.BlockSpec((1, tn), lambda i, j: (0, j)),       # contrast labels
            pl.BlockSpec((tm, 1), lambda i, j: (i, 0)),       # ||a||^2
            pl.BlockSpec((1, tn), lambda i, j: (0, j)),       # ||b||^2
            pl.BlockSpec((tm, 1), lambda i, j: (i, 0)),       # 1/||a||
            pl.BlockSpec((1, tn), lambda i, j: (0, j)),       # ((1-alpha_d)/T)/||b||
        ],
        out_specs=pl.BlockSpec((tm, 1), lambda i, j: (i, 0)),
        scratch_shapes=[pltpu.VMEM((tm, 1), jnp.float32)] * 4,   # m, l, spos, npos
        compiler_params=pltpu.CompilerParams(
            dimension_semantics=("parallel", "arbitrary"),
            vmem_limit_bytes=vmem_limit,
        ),
    )(f_p, f_p, lab_col, lab_row, na2_col, nb2_row, inv_na_col, inv_nbs_row)

    # loss.view(contrast_count, batch_size).mean() == mean over all N real rows.
    return jnp.sum(loss_rows[:N, 0]) / N


def _reference_loss(features, labels, c=0.01, alpha_d=0.5,
                    temperature=0.07, base_temperature=0.07):
    """Pure-JAX reference (same math as the PyTorch module)."""
    bsz, n_views, dim = features.shape
    N = bsz * n_views
    f = features.reshape(N, dim).astype(jnp.float32)
    lab = labels.reshape(-1, 1)
    mask = jnp.tile((lab == lab.T).astype(jnp.float32), (n_views, n_views))

    a = -f[:, None, :]
    b = f[None, :, :]
    xy = jnp.sum(a * b, axis=-1, keepdims=True)
    x2 = jnp.sum(a * a, axis=-1, keepdims=True)
    y2 = jnp.sum(b * b, axis=-1, keepdims=True)
    num = (1 + 2 * c * xy + c * y2) * a + (1 - c * x2) * b
    den = 1 + 2 * c * xy + c * c * x2 * y2
    diff = num / den
    dists = jnp.linalg.norm(diff, axis=-1)
    dist_sim = -2 / c ** 0.5 * jnp.arctanh(jnp.minimum(c ** 0.5 * dists, 1 - 1e-5))
    fn = f / jnp.maximum(jnp.linalg.norm(f, axis=-1, keepdims=True), 1e-12)
    ang_sim = fn @ fn.T
    sim = (alpha_d * dist_sim + (1 - alpha_d) * ang_sim) / temperature
    logits = sim - jnp.max(sim, axis=1, keepdims=True)
    lm = 1.0 - jnp.eye(N, dtype=jnp.float32)
    mask = mask * lm
    exp_logits = jnp.exp(logits) * lm
    log_prob = logits - jnp.log(jnp.sum(exp_logits, axis=1, keepdims=True) + 1e-10)
    mpp = jnp.sum(mask, axis=1)
    mpp = jnp.where(mpp < 1e-6, 1.0, mpp)
    mlpp = jnp.sum(mask * log_prob, axis=1) / mpp
    return jnp.mean(-(temperature / base_temperature) * mlpp)


if __name__ == "__main__":
    key = jax.random.PRNGKey(0)
    k1, k2, k3, k4 = jax.random.split(key, 4)

    # --- primary small test (grid = (1, 1)) --------------------------------------
    bsz, n_views, dim = 4, 2, 32
    # Small-norm features ("already in hyperbolic space" for curvature c=0.01).
    features = 0.1 * jax.random.normal(k1, (bsz, n_views, dim), dtype=jnp.float32)
    labels = jax.random.randint(k2, (bsz,), 0, 3)

    loss = jax.block_until_ready(hyperbolic_supcon_loss(features, labels,
                                                        c=0.01, alpha_d=0.5))
    ref = jax.block_until_ready(_reference_loss(features, labels, c=0.01, alpha_d=0.5))
    np.testing.assert_allclose(np.asarray(loss), np.asarray(ref), rtol=1e-2, atol=2e-3)

    # --- multi-tile test: exercises row/column tiling, padding, and the online
    #     (flash-style) softmax accumulation across column steps -------------------
    bsz2, n_views2, dim2 = 100, 2, 72          # N=200 -> n_pad=256, tm=64, tn=128
    features2 = 0.1 * jax.random.normal(k3, (bsz2, n_views2, dim2), dtype=jnp.float32)
    labels2 = jax.random.randint(k4, (bsz2,), 0, 10)

    loss2 = jax.block_until_ready(
        hyperbolic_supcon_loss(features2, labels2, c=0.01, alpha_d=0.5,
                               block_rows=64, block_cols=128))
    ref2 = jax.block_until_ready(_reference_loss(features2, labels2,
                                                 c=0.01, alpha_d=0.5))
    np.testing.assert_allclose(np.asarray(loss2), np.asarray(ref2), rtol=1e-2, atol=2e-3)

    print("KERNEL_OK")
</pallas_src>

<mosaic_0001>
module attributes {stable_mosaic.version = 11 : i64} {
  func.func @_hyp_supcon_kernel(%arg0: i32, %arg1: i32, %arg2: memref<8x128xf32, #tpu.memory_space<vmem>>, %arg3: memref<8x128xf32, #tpu.memory_space<vmem>>, %arg4: memref<8x1xi32, #tpu.memory_space<vmem>>, %arg5: memref<1x8xi32, #tpu.memory_space<vmem>>, %arg6: memref<8x1xf32, #tpu.memory_space<vmem>>, %arg7: memref<1x8xf32, #tpu.memory_space<vmem>>, %arg8: memref<8x1xf32, #tpu.memory_space<vmem>>, %arg9: memref<1x8xf32, #tpu.memory_space<vmem>>, %arg10: memref<8x1xf32, #tpu.memory_space<vmem>>, %arg11: memref<8x1xf32, #tpu.memory_space<vmem>>, %arg12: memref<8x1xf32, #tpu.memory_space<vmem>>, %arg13: memref<8x1xf32, #tpu.memory_space<vmem>>, %arg14: memref<8x1xf32, #tpu.memory_space<vmem>>) attributes {dimension_semantics = [#tpu.dimension_semantics<parallel>, #tpu.dimension_semantics<arbitrary>], iteration_bounds = array<i64: 1, 1>, scalar_prefetch = 0 : i64, scratch_operands = 4 : i64, tpu.core_type = #tpu.core_type<tc>, window_params = [{transform_indices = @transform_0, window_bounds = array<i64: 8, 128>}, {transform_indices = @transform_1, window_bounds = array<i64: 8, 128>}, {transform_indices = @transform_2, window_bounds = array<i64: 8, 1>}, {transform_indices = @transform_3, window_bounds = array<i64: 1, 8>}, {transform_indices = @transform_4, window_bounds = array<i64: 8, 1>}, {transform_indices = @transform_5, window_bounds = array<i64: 1, 8>}, {transform_indices = @transform_6, window_bounds = array<i64: 8, 1>}, {transform_indices = @transform_7, window_bounds = array<i64: 1, 8>}, {transform_indices = @transform_8, window_bounds = array<i64: 8, 1>}]} {
    %c0_i32 = arith.constant 0 : i32
    %0 = arith.cmpi eq, %arg1, %c0_i32 : i32
    %1 = arith.extui %0 : i1 to i32
    %c0_i32_0 = arith.constant 0 : i32
    %2 = arith.cmpi ne, %1, %c0_i32_0 : i32
    scf.if %2 {
      %cst_53 = arith.constant 0xFF800000 : f32
      %114 = vector.broadcast %cst_53 : f32 to vector<8x1xf32>
      %c0_54 = arith.constant 0 : index
      %c0_55 = arith.constant 0 : index
      %115 = vector.load %arg11[%c0_54, %c0_55] : memref<8x1xf32, #tpu.memory_space<vmem>>, vector<8x1xf32>
      tpu.vector_store %arg11[%c0_54, %c0_55], %114 {strides = array<i32>} : memref<8x1xf32, #tpu.memory_space<vmem>>, vector<8x1xf32>,
      %cst_56 = arith.constant 0.000000e+00 : f32
      %116 = vector.broadcast %cst_56 : f32 to vector<8x1xf32>
      %c0_57 = arith.constant 0 : index
      %c0_58 = arith.constant 0 : index
      %117 = vector.load %arg12[%c0_57, %c0_58] : memref<8x1xf32, #tpu.memory_space<vmem>>, vector<8x1xf32>
      tpu.vector_store %arg12[%c0_57, %c0_58], %116 {strides = array<i32>} : memref<8x1xf32, #tpu.memory_space<vmem>>, vector<8x1xf32>,
      %cst_59 = arith.constant 0.000000e+00 : f32
      %118 = vector.broadcast %cst_59 : f32 to vector<8x1xf32>
      %c0_60 = arith.constant 0 : index
      %c0_61 = arith.constant 0 : index
      %119 = vector.load %arg13[%c0_60, %c0_61] : memref<8x1xf32, #tpu.memory_space<vmem>>, vector<8x1xf32>
      tpu.vector_store %arg13[%c0_60, %c0_61], %118 {strides = array<i32>} : memref<8x1xf32, #tpu.memory_space<vmem>>, vector<8x1xf32>,
      %cst_62 = arith.constant 0.000000e+00 : f32
      %120 = vector.broadcast %cst_62 : f32 to vector<8x1xf32>
      %c0_63 = arith.constant 0 : index
      %c0_64 = arith.constant 0 : index
      %121 = vector.load %arg14[%c0_63, %c0_64] : memref<8x1xf32, #tpu.memory_space<vmem>>, vector<8x1xf32>
      tpu.vector_store %arg14[%c0_63, %c0_64], %120 {strides = array<i32>} : memref<8x1xf32, #tpu.memory_space<vmem>>, vector<8x1xf32>,
    } else {
    }
    %c0 = arith.constant 0 : index
    %c0_1 = arith.constant 0 : index
    %3 = vector.load %arg2[%c0, %c0_1] : memref<8x128xf32, #tpu.memory_space<vmem>>, vector<8x128xf32>
    %c0_2 = arith.constant 0 : index
    %c0_3 = arith.constant 0 : index
    %4 = vector.load %arg3[%c0_2, %c0_3] : memref<8x128xf32, #tpu.memory_space<vmem>>, vector<8x128xf32>
    %cst = arith.constant dense<0.000000e+00> : vector<8x8xf32>
    %5 = tpu.matmul %3, %4, %cst {dimension_numbers = #tpu.dot_dimension_numbers<[1], [1], [0], [0], [0, 0, 1, 0], [], []>, precision = #tpu.contract_precision<fp32>} : vector<8x128xf32>, vector<8x128xf32>, vector<8x8xf32> -> vector<8x8xf32>
    %c0_4 = arith.constant 0 : index
    %c0_5 = arith.constant 0 : index
    %6 = vector.load %arg6[%c0_4, %c0_5] : memref<8x1xf32, #tpu.memory_space<vmem>>, vector<8x1xf32>
    %c0_6 = arith.constant 0 : index
    %c0_7 = arith.constant 0 : index
    %7 = vector.load %arg7[%c0_6, %c0_7] : memref<1x8xf32, #tpu.memory_space<vmem>>, vector<1x8xf32>
    %cst_8 = arith.constant 0.00999999977 : f32
    %8 = vector.broadcast %cst_8 : f32 to vector<8x1xf32>
    %9 = arith.mulf %8, %6 : vector<8x1xf32>
    %cst_9 = arith.constant 1.000000e+00 : f32
    %10 = vector.broadcast %cst_9 : f32 to vector<8x1xf32>
    %11 = arith.subf %10, %9 : vector<8x1xf32>
    %cst_10 = arith.constant 0.00999999977 : f32
    %12 = vector.broadcast %cst_10 : f32 to vector<8x1xf32>
    %13 = arith.mulf %12, %6 : vector<8x1xf32>
    %cst_11 = arith.constant 2.000000e-02 : f32
    %14 = vector.broadcast %cst_11 : f32 to vector<8x1xf32>
    %15 = arith.mulf %14, %11 : vector<8x1xf32>
    %cst_12 = arith.constant 0.00999999977 : f32
    %16 = vector.broadcast %cst_12 : f32 to vector<8x1xf32>
    %17 = arith.mulf %16, %11 : vector<8x1xf32>
    %18 = arith.mulf %17, %11 : vector<8x1xf32>
    %cst_13 = arith.constant 2.000000e-02 : f32
    %19 = vector.broadcast %cst_13 : f32 to vector<8x8xf32>
    %20 = arith.mulf %19, %5 : vector<8x8xf32>
    %cst_14 = arith.constant 0.00999999977 : f32
    %21 = vector.broadcast %cst_14 : f32 to vector<1x8xf32>
    %22 = arith.mulf %21, %7 : vector<1x8xf32>
    %cst_15 = arith.constant 1.000000e+00 : f32
    %23 = vector.broadcast %cst_15 : f32 to vector<1x8xf32>
    %24 = arith.addf %23, %22 : vector<1x8xf32>
    %25 = vector.broadcast %24 : vector<1x8xf32> to vector<8x8xf32>
    %26 = arith.subf %25, %20 : vector<8x8xf32>
    %cst_16 = arith.constant 9.99999974E-5 : f32
    %27 = vector.broadcast %cst_16 : f32 to vector<8x1xf32>
    %28 = arith.mulf %27, %6 : vector<8x1xf32>
    %29 = vector.broadcast %28 : vector<8x1xf32> to vector<8x8xf32>
    %30 = vector.broadcast %7 : vector<1x8xf32> to vector<8x8xf32>
    %31 = arith.mulf %29, %30 : vector<8x8xf32>
    %cst_17 = arith.constant 1.000000e+00 : f32
    %32 = vector.broadcast %cst_17 : f32 to vector<8x8xf32>
    %33 = arith.addf %32, %31 : vector<8x8xf32>
    %34 = arith.subf %33, %20 : vector<8x8xf32>
    %35 = vector.broadcast %13 : vector<8x1xf32> to vector<8x8xf32>
    %36 = arith.mulf %35, %26 : vector<8x8xf32>
    %37 = vector.broadcast %15 : vector<8x1xf32> to vector<8x8xf32>
    %38 = arith.mulf %37, %5 : vector<8x8xf32>
    %39 = arith.subf %36, %38 : vector<8x8xf32>
    %40 = arith.mulf %26, %39 : vector<8x8xf32>
    %41 = vector.broadcast %18 : vector<8x1xf32> to vector<8x8xf32>
    %42 = vector.broadcast %7 : vector<1x8xf32> to vector<8x8xf32>
    %43 = arith.mulf %41, %42 : vector<8x8xf32>
    %44 = arith.addf %40, %43 : vector<8x8xf32>
    %cst_18 = arith.constant 0.000000e+00 : f32
    %45 = vector.broadcast %cst_18 : f32 to vector<8x8xf32>
    %46 = arith.maximumf %44, %45 : vector<8x8xf32>
    %47 = math.absf %34 : vector<8x8xf32>
    %48 = math.sqrt %46 : vector<8x8xf32>
    %cst_19 = arith.constant 0.999989986 : f32
    %49 = vector.broadcast %cst_19 : f32 to vector<8x8xf32>
    %50 = arith.mulf %49, %47 : vector<8x8xf32>
    %51 = arith.minimumf %48, %50 : vector<8x8xf32>
    %52 = arith.addf %47, %51 : vector<8x8xf32>
    %53 = arith.subf %47, %51 : vector<8x8xf32>
    %54 = arith.divf %52, %53 : vector<8x8xf32>
    %55 = math.log %54 : vector<8x8xf32>
    %cst_20 = arith.constant -71.4285736 : f32
    %56 = vector.broadcast %cst_20 : f32 to vector<8x8xf32>
    %57 = arith.mulf %56, %55 : vector<8x8xf32>
    %c0_21 = arith.constant 0 : index
    %c0_22 = arith.constant 0 : index
    %58 = vector.load %arg8[%c0_21, %c0_22] : memref<8x1xf32, #tpu.memory_space<vmem>>, vector<8x1xf32>
    %59 = vector.broadcast %58 : vector<8x1xf32> to vector<8x8xf32>
    %60 = arith.mulf %5, %59 : vector<8x8xf32>
    %c0_23 = arith.constant 0 : index
    %c0_24 = arith.constant 0 : index
    %61 = vector.load %arg9[%c0_23, %c0_24] : memref<1x8xf32, #tpu.memory_space<vmem>>, vector<1x8xf32>
    %62 = vector.broadcast %61 : vector<1x8xf32> to vector<8x8xf32>
    %63 = arith.mulf %60, %62 : vector<8x8xf32>
    %64 = arith.addf %57, %63 : vector<8x8xf32>
    %c8_i32 = arith.constant 8 : i32
    %65 = arith.muli %arg1, %c8_i32 : i32
    %66 = tpu.iota {dimensions = array<i32: 1>} : vector<8x8xi32>
    %67 = vector.broadcast %65 : i32 to vector<8x8xi32>
    %68 = arith.addi %67, %66 : vector<8x8xi32>
    %c8_i32_25 = arith.constant 8 : i32
    %69 = arith.muli %arg0, %c8_i32_25 : i32
    %70 = tpu.iota {dimensions = array<i32: 0>} : vector<8x8xi32>
    %71 = vector.broadcast %69 : i32 to vector<8x8xi32>
    %72 = arith.addi %71, %70 : vector<8x8xi32>
    %73 = arith.cmpi ne, %68, %72 : vector<8x8xi32>
    %c0_26 = arith.constant 0 : index
    %c0_27 = arith.constant 0 : index
    %74 = vector.load %arg4[%c0_26, %c0_27] : memref<8x1xi32, #tpu.memory_space<vmem>>, vector<8x1xi32>
    %c0_28 = arith.constant 0 : index
    %c0_29 = arith.constant 0 : index
    %75 = vector.load %arg5[%c0_28, %c0_29] : memref<1x8xi32, #tpu.memory_space<vmem>>, vector<1x8xi32>
    %76 = vector.broadcast %74 : vector<8x1xi32> to vector<8x8xi32>
    %77 = vector.broadcast %75 : vector<1x8xi32> to vector<8x8xi32>
    %78 = arith.cmpi eq, %76, %77 : vector<8x8xi32>
    %79 = arith.andi %78, %73 : vector<8x8xi1>
    %80 = arith.extui %79 : vector<8x8xi1> to vector<8x8xi32>
    %81 = arith.sitofp %80 : vector<8x8xi32> to vector<8x8xf32>
    %c0_30 = arith.constant 0 : index
    %c0_31 = arith.constant 0 : index
    %82 = vector.load %arg11[%c0_30, %c0_31] : memref<8x1xf32, #tpu.memory_space<vmem>>, vector<8x1xf32>
    %cst_32 = arith.constant dense<0xFF800000> : vector<8xf32>
    %83 = vector.multi_reduction <maximumf>, %64, %cst_32 [1] : vector<8x8xf32> to vector<8xf32>
    %84 = vector.shape_cast %83 : vector<8xf32> to vector<8x1xf32>
    %85 = arith.maximumf %82, %84 : vector<8x1xf32>
    %86 = arith.subf %82, %85 : vector<8x1xf32>
    %87 = math.exp %86 : vector<8x1xf32>
    %cst_33 = arith.constant 0xFF800000 : f32
    %88 = vector.broadcast %cst_33 : f32 to vector<8x8xf32>
    %89 = arith.select %73, %64, %88 : vector<8x8xi1>, vector<8x8xf32>
    %90 = vector.broadcast %85 : vector<8x1xf32> to vector<8x8xf32>
    %91 = arith.subf %89, %90 : vector<8x8xf32>
    %92 = math.exp %91 : vector<8x8xf32>
    %c0_34 = arith.constant 0 : index
    %c0_35 = arith.constant 0 : index
    %93 = vector.load %arg12[%c0_34, %c0_35] : memref<8x1xf32, #tpu.memory_space<vmem>>, vector<8x1xf32>
    %94 = arith.mulf %93, %87 : vector<8x1xf32>
    %cst_36 = arith.constant dense<0.000000e+00> : vector<8xf32>
    %95 = vector.multi_reduction <add>, %92, %cst_36 [1] : vector<8x8xf32> to vector<8xf32>
    %96 = vector.shape_cast %95 : vector<8xf32> to vector<8x1xf32>
    %97 = arith.addf %94, %96 : vector<8x1xf32>
    %c0_37 = arith.constant 0 : index
    %c0_38 = arith.constant 0 : index
    %98 = vector.load %arg12[%c0_37, %c0_38] : memref<8x1xf32, #tpu.memory_space<vmem>>, vector<8x1xf32>
    tpu.vector_store %arg12[%c0_37, %c0_38], %97 {strides = array<i32>} : memref<8x1xf32, #tpu.memory_space<vmem>>, vector<8x1xf32>,
    %c0_39 = arith.constant 0 : index
    %c0_40 = arith.constant 0 : index
    %99 = vector.load %arg11[%c0_39, %c0_40] : memref<8x1xf32, #tpu.memory_space<vmem>>, vector<8x1xf32>
    tpu.vector_store %arg11[%c0_39, %c0_40], %85 {strides = array<i32>} : memref<8x1xf32, #tpu.memory_space<vmem>>, vector<8x1xf32>,
    %c0_41 = arith.constant 0 : index
    %c0_42 = arith.constant 0 : index
    %100 = vector.load %arg13[%c0_41, %c0_42] : memref<8x1xf32, #tpu.memory_space<vmem>>, vector<8x1xf32>
    %101 = arith.mulf %81, %64 : vector<8x8xf32>
    %cst_43 = arith.constant dense<0.000000e+00> : vector<8xf32>
    %102 = vector.multi_reduction <add>, %101, %cst_43 [1] : vector<8x8xf32> to vector<8xf32>
    %103 = vector.shape_cast %102 : vector<8xf32> to vector<8x1xf32>
    %104 = arith.addf %100, %103 : vector<8x1xf32>
    %c0_44 = arith.constant 0 : index
    %c0_45 = arith.constant 0 : index
    %105 = vector.load %arg13[%c0_44, %c0_45] : memref<8x1xf32, #tpu.memory_space<vmem>>, vector<8x1xf32>
    tpu.vector_store %arg13[%c0_44, %c0_45], %104 {strides = array<i32>} : memref<8x1xf32, #tpu.memory_space<vmem>>, vector<8x1xf32>,
    %c0_46 = arith.constant 0 : index
    %c0_47 = arith.constant 0 : index
    %106 = vector.load %arg14[%c0_46, %c0_47] : memref<8x1xf32, #tpu.memory_space<vmem>>, vector<8x1xf32>
    %cst_48 = arith.constant dense<0.000000e+00> : vector<8xf32>
    %107 = vector.multi_reduction <add>, %81, %cst_48 [1] : vector<8x8xf32> to vector<8xf32>
    %108 = vector.shape_cast %107 : vector<8xf32> to vector<8x1xf32>
    %109 = arith.addf %106, %108 : vector<8x1xf32>
    %c0_49 = arith.constant 0 : index
    %c0_50 = arith.constant 0 : index
    %110 = vector.load %arg14[%c0_49, %c0_50] : memref<8x1xf32, #tpu.memory_space<vmem>>, vector<8x1xf32>
    tpu.vector_store %arg14[%c0_49, %c0_50], %109 {strides = array<i32>} : memref<8x1xf32, #tpu.memory_space<vmem>>, vector<8x1xf32>,
    %c0_i32_51 = arith.constant 0 : i32
    %111 = arith.cmpi eq, %arg1, %c0_i32_51 : i32
    %112 = arith.extui %111 : i1 to i32
    %c0_i32_52 = arith.constant 0 : i32
    %113 = arith.cmpi ne, %112, %c0_i32_52 : i32
    scf.if %113 {
      %c0_53 = arith.constant 0 : index
      %c0_54 = arith.constant 0 : index
      %114 = vector.load %arg14[%c0_53, %c0_54] : memref<8x1xf32, #tpu.memory_space<vmem>>, vector<8x1xf32>
      %cst_55 = arith.constant 9.99999997E-7 : f32
      %115 = vector.broadcast %cst_55 : f32 to vector<8x1xf32>
      %116 = arith.cmpf olt, %114, %115 : vector<8x1xf32>
      %cst_56 = arith.constant 1.000000e+00 : f32
      %117 = vector.broadcast %cst_56 : f32 to vector<8x1xf32>
      %118 = arith.select %116, %117, %114 : vector<8x1xi1>, vector<8x1xf32>
      %c0_57 = arith.constant 0 : index
      %c0_58 = arith.constant 0 : index
      %119 = vector.load %arg11[%c0_57, %c0_58] : memref<8x1xf32, #tpu.memory_space<vmem>>, vector<8x1xf32>
      %c0_59 = arith.constant 0 : index
      %c0_60 = arith.constant 0 : index
      %120 = vector.load %arg12[%c0_59, %c0_60] : memref<8x1xf32, #tpu.memory_space<vmem>>, vector<8x1xf32>
      %cst_61 = arith.constant 1.000000e-10 : f32
      %121 = vector.broadcast %cst_61 : f32 to vector<8x1xf32>
      %122 = arith.addf %120, %121 : vector<8x1xf32>
      %123 = math.log %122 : vector<8x1xf32>
      %124 = arith.addf %119, %123 : vector<8x1xf32>
      %c0_62 = arith.constant 0 : index
      %c0_63 = arith.constant 0 : index
      %125 = vector.load %arg13[%c0_62, %c0_63] : memref<8x1xf32, #tpu.memory_space<vmem>>, vector<8x1xf32>
      %126 = arith.mulf %114, %124 : vector<8x1xf32>
      %127 = arith.subf %125, %126 : vector<8x1xf32>
      %128 = arith.divf %127, %118 : vector<8x1xf32>
      %cst_64 = arith.constant -1.000000e+00 : f32
      %129 = vector.broadcast %cst_64 : f32 to vector<8x1xf32>
      %130 = arith.mulf %129, %128 : vector<8x1xf32>
      %c0_65 = arith.constant 0 : index
      %c0_66 = arith.constant 0 : index
      %131 = vector.load %arg10[%c0_65, %c0_66] : memref<8x1xf32, #tpu.memory_space<vmem>>, vector<8x1xf32>
      tpu.vector_store %arg10[%c0_65, %c0_66], %130 {strides = array<i32>} : memref<8x1xf32, #tpu.memory_space<vmem>>, vector<8x1xf32>,
    } else {
    }
    return
  }
  func.func @transform_0(%arg0: i32, %arg1: i32) -> (i32, i32) {
    %c0_i32 = arith.constant 0 : i32
    %c0_i32_0 = arith.constant 0 : i32
    return %arg0, %c0_i32 : i32, i32
  }
  func.func @transform_1(%arg0: i32, %arg1: i32) -> (i32, i32) {
    %c0_i32 = arith.constant 0 : i32
    %c0_i32_0 = arith.constant 0 : i32
    return %arg1, %c0_i32 : i32, i32
  }
  func.func @transform_2(%arg0: i32, %arg1: i32) -> (i32, i32) {
    %c0_i32 = arith.constant 0 : i32
    %c0_i32_0 = arith.constant 0 : i32
    return %arg0, %c0_i32 : i32, i32
  }
  func.func @transform_3(%arg0: i32, %arg1: i32) -> (i32, i32) {
    %c0_i32 = arith.constant 0 : i32
    %c0_i32_0 = arith.constant 0 : i32
    return %c0_i32, %arg1 : i32, i32
  }
  func.func @transform_4(%arg0: i32, %arg1: i32) -> (i32, i32) {
    %c0_i32 = arith.constant 0 : i32
    %c0_i32_0 = arith.constant 0 : i32
    return %arg0, %c0_i32 : i32, i32
  }
  func.func @transform_5(%arg0: i32, %arg1: i32) -> (i32, i32) {
    %c0_i32 = arith.constant 0 : i32
    %c0_i32_0 = arith.constant 0 : i32
    return %c0_i32, %arg1 : i32, i32
  }
  func.func @transform_6(%arg0: i32, %arg1: i32) -> (i32, i32) {
    %c0_i32 = arith.constant 0 : i32
    %c0_i32_0 = arith.constant 0 : i32
    return %arg0, %c0_i32 : i32, i32
  }
  func.func @transform_7(%arg0: i32, %arg1: i32) -> (i32, i32) {
    %c0_i32 = arith.constant 0 : i32
    %c0_i32_0 = arith.constant 0 : i32
    return %c0_i32, %arg1 : i32, i32
  }
  func.func @transform_8(%arg0: i32, %arg1: i32) -> (i32, i32) {
    %c0_i32 = arith.constant 0 : i32
    %c0_i32_0 = arith.constant 0 : i32
    return %arg0, %c0_i32 : i32, i32
  }
}

</mosaic_0001>

<bundles_post_ra>
// kernel: tpu_custom_call.1
= control target key start
LH: loop header
LB: loop body
LE: loop exit
PB: predicated region body
PF: predicated region fallthrough
CT: control target
= control target key end

     0   :  { %v734_v0 = vmov 0.0   ;;  %vm735_vm0 = vmmov 0   ;;  %v736_v7 = vmov 0   ;;  %vm33_vm1 = vcmask 7168   ;;  %s851_s1 = inlined_call_operand.vmem [shape: f32[8,128], index: 1, kind: input, shape index: {}]   ;;  %s852_s0 = inlined_call_operand.vmem [shape: f32[8,128], index: 0, kind: input, shape index: {}]   ;;  %s853_s4 = inlined_call_operand.vmem [shape: f32[8,1], index: 4, kind: input, shape index: {}]   ;;  %s854_s6 = inlined_call_operand.vmem [shape: f32[8,1], index: 6, kind: input, shape index: {}]   ;;  %s855_s5 = inlined_call_operand.vmem [shape: f32[1,8], index: 5, kind: input, shape index: {}]   ;;  %s856_s7 = inlined_call_operand.vmem [shape: f32[1,8], index: 7, kind: input, shape index: {}]   ;;  %s857_s2 = inlined_call_operand.vmem [shape: s32[8,1], index: 2, kind: input, shape index: {}]   ;;  %s858_s3 = inlined_call_operand.vmem [shape: s32[1,8], index: 3, kind: input, shape index: {}]   ;;  %s859_s8 = inlined_call_operand.vmem [shape: f32[8,1], index: 8, kind: output, shape index: {}]  }
   0x1   :  { %690 = vmatprep.subr.mxu0 %v734_v0  ;;  %v39_v1 = vld [vmem:[%s851_s1] sm:$0xff]  ;;  %675 = vmatprep.subr.mxu1 %v734_v0  ;;  %v737_v22 = vmov -inf   ;;  %35 = vst.msk [vmem:[#allocation3] sm:$0xff] %vm33_vm1, %v734_v0  ;;  %36 = vst.msk [vmem:[#allocation4] sm:$0xff] %vm33_vm1, %v734_v0  ;;  %v497_v24 = vlaneseq  ;;  %vm598_vm4 = vcmask 64512  }
   0x2   :  { %v38_v2 = vld [vmem:[%s852_s0] sm:$0xff]  ;;  %v41_v4 = vand.u32 4294901760, %v39_v1  ;;  %692 = vmatprep.mubr.msk.f32.mxu0 %vm735_vm0, %v734_v0  ;;  %677 = vmatprep.mubr.msk.f32.mxu1 %vm735_vm0, %v734_v0  ;;  %34 = vst.msk [vmem:[#allocation2] sm:$0xff] %vm33_vm1, %v737_v22  ;;  %37 = vst.msk [vmem:[#allocation5] sm:$0xff] %vm33_vm1, %v734_v0 }
   0x3   :  { %v486_v3 = vld [vmem:[%s853_s4] sm:$0xff]  ;;  %v106_v5 = vand.u32 4294901760, %v38_v2  ;;  %718 = vset.pattern.permute.xlu0 %v736_v7  ;;  %719 = vset.pattern.permute.xlu1 %v736_v7  ;;  %v824_v26 = vshrl.u32 %v497_v24, 7 }
   0x4   :  { %v488_v6 = vmul.f32 0.01, %v486_v3  ;;  %v118_v8 = vsub.f32 %v39_v1, %v41_v4  ;;  %691 = vmatpush3.xpose.msra.mxu0 %v41_v4  ;;  %676 = vmatpush3.xpose.msra.mxu1 %v41_v4  ;;  %v503_v20 = vmul.f32 0.0001, %v486_v3  ;;  %v557_v21 = vld [vmem:[%s854_s6] sm:$0xff] }
   0x5   :  { %v107_v9 = vsub.f32 %v38_v2, %v106_v5  ;;  %680 = vmatprep.subr.mxu1 %v734_v0  ;;  %695 = vmatprep.subr.mxu0 %v734_v0  ;;  %v487_v23 = vld [vmem:[%s855_s5] sm:$0x1]  ;;  %v499_v30 = vsub.s32 0, %v824_v26 }
   0x6   :  { %v489_v10 = vsub.f32 1.0, %v488_v6  ;;  %v119_v12 = vand.u32 4294901760, %v118_v8  ;;  %520 = vperm.xlu0 %718, %v488_v6   ;;  %v494_v25 = vmul.f32 0.01, %v487_v23 }
   0x7   :  { %v108_v11 = vand.u32 4294901760, %v107_v9  ;;  %v513_v40 = vrot.slane %v487_v23, %v499_v30 }
   0x8   :  { %v491_v13 = vmul.f32 0.01, %v489_v10  ;;  %v490_v14 = vmul.f32 0.02, %v489_v10  ;;  %v120_v16 = vsub.f32 %v118_v8, %v119_v12  ;;  %v495_v28 = vadd.f32 1.0, %v494_v25 }
   0x9   :  { %693 = vmatmul.mubr.f32.vlgmr.msra.gmra.mrb[0].mxu0 %v108_v11  ;;  %v109_v15 = vsub.f32 %v107_v9, %v108_v11 }
   0xa   :  { %v492_v17 = vmul.f32 %v491_v13, %v489_v10  ;;  %696 = vmatpush3.xpose.msra.mxu0 %v119_v12  ;;  %697 = vmatprep.mubr.msk.f32.mxu0 %vm735_vm0, %v734_v0  ;;  %v121_v19 = vand.u32 4294901760, %v120_v16  ;;  %v500_v33 = vrot.slane %v495_v28, %v499_v30  ;;  %v597_v10 = vld [vmem:[#allocation2] sm:$0xff] }
   0xb   :  { %v110_v18 = vand.u32 4294901760, %v109_v15  ;;  %700 = vmatprep.subr.mxu0 %v734_v0  ;;  %526 = vperm.xlu0 %718, %v490_v14   ;;  %v584_v14 = vld [vmem:[%s857_s2] sm:$0xff]  ;;  %v575_v15 = vand.u32 127, %v497_v24 }
   0xc   :  { %534 = vperm.xlu1 %719, %v492_v17  }
   0xd   :  { %678 = vmatmul.mubr.f32.vlgmr.msra.gmra.mrb[0].mxu1 %v110_v18  ;;  %vm583_vm5 = vcmp.ne.s32.totalorder %v575_v15, %v824_v26 }
   0xe   :  { %681 = vmatpush3.xpose.msra.mxu1 %v121_v19  ;;  %682 = vmatprep.mubr.msk.f32.mxu1 %vm735_vm0, %v734_v0  ;;  %v661_v19 = vld [vmem:[%s858_s3] ss:$0 sm:$0xff] }
   0xf   :  { %685 = vmatprep.subr.mxu1 %v734_v0  ;;  %560 = vperm.xlu0 %718, %v557_v21  }
  0x10   :  { %506 = vperm.xlu1 %719, %v503_v20  }
  0x11   :  { %698 = vmatmul.mubr.f32.vlgmr.msra.gmra.mrb[0].mxu0 %v106_v5 }
  0x12   :  { %701 = vmatpush3.xpose.msra.mxu0 %v41_v4  ;;  %702 = vmatprep.mubr.msk.f32.mxu0 %vm735_vm0, %v734_v0  ;;  %v660_v4 = vld [vmem:[%s856_s7] ss:$0 sm:$0xff] }
  0x15   :  { %683 = vmatmul.mubr.f32.vlgmr.msra.gmra.mrb[0].mxu1 %v106_v5 }
  0x16   :  { %686 = vmatpush3.xpose.msra.mxu1 %v118_v8  ;;  %687 = vmatprep.mubr.msk.f32.mxu1 %vm735_vm0, %v734_v0 }
  0x19   :  { %703 = vmatmul.mubr.f32.vlgmr.msra.gmra.mrb[0].mxu0 %v106_v5 }
  0x1d   :  { %688 = vmatmul.mubr.f32.vlgmr.msra.gmra.mrb[0].mxu1 %v107_v9 }
  0x85   :  { %v521_v31 = vpop.permute.xlu0 %520 }
  0x8a   :  { %v527_v39 = vpop.permute.xlu0 %526 }
  0x8b   :  { %v535_v37 = vpop.permute.xlu1 %534 }
  0x8c   :  { %v537_v43 = vmul.f32 %v535_v37, %v513_v40 }
  0x8e   :  { %v561_v1 = vpop.permute.xlu0 %560 }
  0x8f   :  { %v507_v45 = vpop.permute.xlu1 %506 }
  0x90   :  { %v515_v48 = vmul.f32 %v513_v40, %v507_v45 }
  0x92   :  { %v516_v50 = vadd.f32 1.0, %v515_v48 }
  0xec   :  { %v482_v27 = vpop.f32.mrb[0].mxu0 }
  0xed   :  { %v704_v29 = vpop.f32.mrb[1].mxu0 }
  0xee   :  { %v631_v29 = vld [vmem:[#allocation5] sm:$0xff] }
  0xf0   :  { %v262_v32 = vpop.f32.mrb[0].mxu1 }
  0xf1   :  { %v705_v34 = vadd.f32 %v482_v27, %v262_v32  ;;  %v689_v35 = vpop.f32.mrb[1].mxu1  ;;  %v624_v32 = vld [vmem:[#allocation4] sm:$0xff] }
  0xf3   :  { %v493_v36 = vmul.f32 0.02, %v705_v34  ;;  %v529_v42 = vmul.f32 %v705_v34, %v527_v39  ;;  %v563_v2 = vmul.f32 %v705_v34, %v561_v1  ;;  %v615_v34 = vld [vmem:[#allocation3] sm:$0xff] }
  0xf5   :  { %v502_v38 = vsub.f32 %v500_v33, %v493_v36  ;;  %v517_v51 = vsub.f32 %v516_v50, %v493_v36  ;;  %v571_v7 = vmul.f32 %v660_v4, %v563_v2 }
  0xf7   :  { %v523_v41 = vmul.f32 %v521_v31, %v502_v38  ;;  %v540_v52 = vand.u32 2147483647, %v517_v51 }
  0xf9   :  { %v530_v44 = vsub.f32 %v523_v41, %v529_v42  ;;  %v548_v57 = vmul.f32 0.99999, %v540_v52 }
  0xfb   :  { %v531_v46 = vmul.f32 %v530_v44, %v502_v38 }
  0xfd   :  { %v538_v47 = vadd.f32 %v537_v43, %v531_v46 }
  0xff   :  { %v539_v49 = vmax.f32 %v538_v47, 0.0 }
 0x101   :  { %720 = vrsqrt.f32 %v539_v49  ;;  %vm543_vm2 = vcmp.eq.f32.partialorder %v539_v49, inf  ;;  %v546_v55 = vand.u32 2147483648, %v539_v49  ;;  %vm545_vm3 = vcmp.eq.f32.partialorder %v539_v49, 0.0 }
 0x10b   :  { %v721_v53 = vpop.eup %720 }
 0x10c   :  { %v542_v54 = vmul.f32 %v721_v53, %v539_v49 }
 0x10e   :  { %v544_v56 = vsel %vm543_vm2, %v539_v49, %v542_v54 }
 0x10f   :  { %v547_v58 = vsel %vm545_vm3, %v546_v55, %v544_v56 }
 0x110   :  { %v549_v59 = vmin.f32 %v547_v58, %v548_v57 }
 0x112   :  { %v551_v60 = vsub.f32 %v540_v52, %v549_v59  ;;  %v550_v61 = vadd.f32 %v549_v59, %v540_v52 }
 0x114   :  { %722 = vrcp.f32 %v551_v60 }
 0x11e   :  { %v723_v62 = vpop.eup %722 }
 0x11f   :  { %v553_v63 = vmul.f32 %v723_v62, %v550_v61 }
 0x121   :  { %724 = vlog2.f32 %v553_v63 }
 0x12b   :  { %v725_v3 = vpop.eup %724 }
 0x12c   :  { %v555_v5 = vmul.f32 0.6931472, %v725_v3 }
 0x12e   :  { %v556_v6 = vmul.f32 -71.42857, %v555_v5 }
 0x130   :  { %v572_v8 = vadd.f32 %v571_v7, %v556_v6 }
 0x132   :  { %v599_v9 = vsel %vm598_vm4, %v572_v8, -inf  ;;  %v606_v16 = vsel %vm583_vm5, %v572_v8, -inf }
 0x133   :  { %600 = vmax.xlane.f32.xlu1 %v599_v9 }
 0x1c0   :  { %v601_v11 = vpop.xlane.xlu1 %600 }
 0x1c1   :  { %v602_v12 = vmax.f32 %v597_v10, %v601_v11 }
 0x1c3   :  { %v603_v13 = vsub.f32 %v597_v10, %v602_v12  ;;  %623 = vst.msk [vmem:[#allocation2] sm:$0xff] %vm33_vm1, %v602_v12  ;;  %609 = vperm.xlu0 %718, %v602_v12  }
 0x1c5   :  { %v604_v28 = vmul.f32 1.442695, %v603_v13 }
 0x1c7   :  { %587 = vperm.xlu0 %718, %v584_v14  }
 0x1ca   :  { %v643_v45 = vld [vmem:[#allocation2] sm:$0xff] }
 0x242   :  { %v610_v17 = vpop.permute.xlu0 %609 }
 0x243   :  { %v612_v18 = vsub.f32 %v606_v16, %v610_v17 }
 0x245   :  { %v613_v20 = vmul.f32 1.442695, %v612_v18 }
 0x246   :  { %v588_v21 = vpop.permute.xlu0 %587 }
 0x247   :  { %726 = vpow2.f32 %v613_v20  ;;  %vm593_vm6 = vcmp.eq.s32.totalorder %v588_v21, %v661_v19 }
 0x248   :  { %vm594_vm7 = vmand %vm593_vm6, %vm583_vm5  ;;  %728 = vpow2.f32 %v604_v28 }
 0x249   :  { %v662_v22 = vsel %vm594_vm7, 1.0, %v734_v0 }
 0x24a   :  { %v632_v23 = vsel %vm598_vm4, %v662_v22, 0.0  ;;  %v625_v25 = vmul.f32 %v662_v22, %v572_v8 }
 0x24b   :  { %633 = vadd.xlane.f32.xlu1 %v632_v23 }
 0x24c   :  { %v626_v24 = vsel %vm598_vm4, %v625_v25, 0.0 }
 0x24f   :  { %627 = vadd.xlane.f32.xlu1 %v626_v24 }
 0x251   :  { %v727_v26 = vpop.eup %726 }
 0x252   :  { %v617_v27 = vsel %vm598_vm4, %v727_v26, 0.0  ;;  %v729_v0 = vpop.eup %728 }
 0x253   :  { %618 = vadd.xlane.f32.xlu0 %v617_v27  ;;  %v616_v36 = vmul.f32 %v729_v0, %v615_v34 }
 0x2d8   :  { %v634_v30 = vpop.xlane.xlu1 %633 }
 0x2d9   :  { %v635_v31 = vadd.f32 %v634_v30, %v631_v29 }
 0x2db   :  { %636 = vst.msk [vmem:[#allocation5] sm:$0xff] %vm33_vm1, %v635_v31 }
 0x2dc   :  { %v628_v33 = vpop.xlane.xlu1 %627 }
 0x2dd   :  { %v629_v35 = vadd.f32 %v628_v33, %v624_v32 }
 0x2df   :  { %630 = vst.msk [vmem:[#allocation4] sm:$0xff] %vm33_vm1, %v629_v35 }
 0x2e0   :  { %v619_v37 = vpop.xlane.xlu0 %618 }
 0x2e1   :  { %v620_v38 = vadd.f32 %v619_v37, %v616_v36 }
 0x2e2   :  { %v640_v41 = vld [vmem:[#allocation5] sm:$0xff] }
 0x2e3   :  { %622 = vst.msk [vmem:[#allocation3] sm:$0xff] %vm33_vm1, %v620_v38  ;;  %vm641_vm8 = vcmp.lt.f32.partialorder %v640_v41, 1e-06 }
 0x2e4   :  { %v642_v42 = vsel %vm641_vm8, 1.0, %v640_v41 }
 0x2e6   :  { %v649_v48 = vld [vmem:[#allocation4] sm:$0xff] }
 0x2ea   :  { %v644_v39 = vld [vmem:[#allocation3] sm:$0xff] }
 0x2eb   :  { %v645_v40 = vadd.f32 1e-10, %v644_v39 }
 0x2ed   :  { %730 = vlog2.f32 %v645_v40 }
 0x2ee   :  { %732 = vrcp.f32 %v642_v42 }
 0x2f7   :  { %v731_v43 = vpop.eup %730 }
 0x2f8   :  { %v647_v44 = vmul.f32 0.6931472, %v731_v43  ;;  %v733_v50 = vpop.eup %732 }
 0x2fa   :  { %v648_v46 = vadd.f32 %v647_v44, %v643_v45 }
 0x2fc   :  { %v650_v47 = vmul.f32 %v648_v46, %v640_v41 }
 0x2fe   :  { %v651_v49 = vsub.f32 %v649_v48, %v650_v47 }
 0x300   :  { %v653_v51 = vmul.f32 %v733_v50, %v651_v49 }
 0x302   :  { %v654_v52 = vmul.f32 -1.0, %v653_v51 }
 0x304   :  { %655 = vst.msk [vmem:[%s859_s8] sm:$0xff] %vm33_vm1, %v654_v52 }

</bundles_post_ra>
